<compile_context>
chip_gen: v6e
topology: v6e:2x2x1
jax: 0.10.0
libtpu: 0.0.40
codegen_flags: <defaults>
</compile_context>

<pallas_src>
from typing import NamedTuple

import jax
import jax.numpy as jnp
from jax import lax
from jax.experimental import pallas as pl
from jax.experimental.pallas import tpu as pltpu


_TM_CAP = 512            # max batch-tile rows (K-tiled / huge-batch path)
_LANE = 128
_MiB = 1024 * 1024


def _round_up(v, m):
    return ((v + m - 1) // m) * m


def _vmem_capacity_bytes():
    try:
        return int(pltpu.get_tpu_info().vmem_capacity_bytes)
    except Exception:
        return 64 * _MiB   # v7x per-TC capacity: the most restrictive gen


class CEncoderPlan(NamedTuple):
    n: int
    in_ch: int
    n_pad: int
    k_pad: int            # K extent stored in the prepared weight
    tk: int               # K tile (== k_pad in the resident variant)
    resident: bool
    weight_buffers: int
    compute_dtype: jnp.dtype
    vmem_cap: int


class CEncoderParams(NamedTuple):
    weight: jax.Array     # (n_pad, k_pad), compute_dtype  (nn.Linear layout, padded)
    bias: jax.Array       # (1, n_pad), float32
    plan: CEncoderPlan


def _make_plan(n, in_ch, compute_dtype):
    n_pad = _round_up(n, _LANE)           # lane-dense output
    item = jnp.dtype(compute_dtype).itemsize
    vmem_cap = _vmem_capacity_bytes()
    budget = (vmem_cap * 3) // 4          # headroom for Mosaic internals

    # Non-weight VMEM demand, upper bound (TM = _TM_CAP, double-buffered
    # activation/output tiles, f32 bias, slack).
    other = (2 * _TM_CAP * in_ch * item
             + 2 * _TM_CAP * n_pad * 4
             + 2 * n_pad * 4
             + 1 * _MiB)
    w_bytes = n_pad * in_ch * item

    if 2 * w_bytes + other <= budget:
        # Weight fits double-buffered: fully resident, default pipelining.
        return CEncoderPlan(n, in_ch, n_pad, in_ch, in_ch, True, 2,
                            jnp.dtype(compute_dtype), vmem_cap)
    if w_bytes + other <= budget:
        # Fits only single-buffered; block index never changes so Buffered(1)
        # costs nothing (v7x 64 MiB case).
        return CEncoderPlan(n, in_ch, n_pad, in_ch, in_ch, True, 1,
                            jnp.dtype(compute_dtype), vmem_cap)

    # K-tiled fallback: weight too large to hold resident.
    k_pad = in_ch if in_ch % _LANE == 0 else _round_up(in_ch, _LANE)
    tk = _LANE
    for cand in (2048, 1024, 512, 256, 128):
        if k_pad % cand == 0 and 2 * n_pad * cand * item <= budget // 2:
            tk = cand
            break
    return CEncoderPlan(n, in_ch, n_pad, k_pad, tk, False, 2,
                        jnp.dtype(compute_dtype), vmem_cap)


def prepare_c_encoder_params(weight, bias, compute_dtype=jnp.float32):
    """One-time parameter prep (pad + cast), hoisted out of the hot path.

    weight: (n, n*n) torch nn.Linear layout (out_features, in_features)
    bias:   (n,)
    """
    n, in_ch = weight.shape
    plan = _make_plan(n, in_ch, compute_dtype)
    w_p = jnp.pad(weight, ((0, plan.n_pad - n), (0, plan.k_pad - in_ch)))
    w_p = w_p.astype(compute_dtype)
    b_p = jnp.pad(bias, (0, plan.n_pad - n)).reshape(1, plan.n_pad)
    b_p = b_p.astype(jnp.float32)
    return CEncoderParams(weight=w_p, bias=b_p, plan=plan)


# ---------------------------------------------------------------------------
# Kernels
# ---------------------------------------------------------------------------

def _resident_kernel(x_ref, w_ref, b_ref, o_ref):
    # x: (TM, K)  w: (N_pad, K)  b: (1, N_pad)  o: (TM, N_pad)
    # Contract K of x against K of W (x @ W^T) natively on the MXU — no
    # accumulator scratch, no init/epilogue: the whole K reduction is one step.
    acc = lax.dot_general(
        x_ref[...], w_ref[...],
        dimension_numbers=(((1,), (1,)), ((), ())),
        preferred_element_type=jnp.float32,
    )
    o_ref[...] = (acc + b_ref[...]).astype(o_ref.dtype)


def _ktiled_kernel(x_ref, w_ref, b_ref, o_ref, acc_ref):
    # Fallback for weights too large to hold VMEM-resident.
    k = pl.program_id(1)

    @pl.when(k == 0)
    def _():
        acc_ref[...] = jnp.zeros_like(acc_ref)

    acc_ref[...] += lax.dot_general(
        x_ref[...], w_ref[...],
        dimension_numbers=(((1,), (1,)), ((), ())),
        preferred_element_type=jnp.float32,
    )

    @pl.when(k == pl.num_programs(1) - 1)
    def _():
        o_ref[...] = (acc_ref[...] + b_ref[...]).astype(o_ref.dtype)


# ---------------------------------------------------------------------------
# Forward
# ---------------------------------------------------------------------------

def c_encoder_forward(x, params):
    """out = x.reshape(B, -1) @ W^T + b  (torch C_Encoder forward)."""
    plan = params.plan
    B = x.shape[0]
    out_dtype = x.dtype

    x_flat = x.reshape(B, plan.in_ch)
    if x_flat.dtype != plan.compute_dtype:
        x_flat = x_flat.astype(plan.compute_dtype)

    x_item = jnp.dtype(plan.compute_dtype).itemsize
    w_item = x_item
    out_item = jnp.dtype(out_dtype).itemsize

    # Batch tiling: size TM to the real batch; split into 2 tiles only when
    # there is enough work to feed both v7x TensorCores.
    sub = 16 if x_item == 2 else 8
    if B > _TM_CAP:
        tm = _TM_CAP
    elif B >= 256:
        tm = _round_up((B + 1) // 2, sub)   # 2 batch tiles -> both TCs
    else:
        tm = B                              # full-dim block, no batch padding
    grid_m = pl.cdiv(B, tm)

    if plan.resident:
        w_spec_kwargs = {}
        if plan.weight_buffers == 1:
            # Weight block index never changes -> a 2nd buffer is pure waste.
            w_spec_kwargs["pipeline_mode"] = pl.Buffered(1)
        w_spec = pl.BlockSpec((plan.n_pad, plan.k_pad), lambda i: (0, 0),
                              **w_spec_kwargs)

        needed = (plan.weight_buffers * plan.n_pad * plan.k_pad * w_item
                  + 2 * tm * plan.k_pad * x_item
                  + 2 * tm * plan.n_pad * out_item
                  + 2 * plan.n_pad * 4
                  + 2 * _MiB)
        vmem_limit = int(min(plan.vmem_cap, max(needed, 32 * _MiB)))

        cost = pl.CostEstimate(
            flops=2 * B * plan.k_pad * plan.n_pad,
            transcendentals=0,
            bytes_accessed=(B * plan.k_pad * x_item              # x, read once
                            + plan.n_pad * plan.k_pad * w_item   # W, read once
                            + plan.n_pad * 4                     # bias
                            + B * plan.n_pad * out_item),        # out
        )

        out = pl.pallas_call(
            _resident_kernel,
            out_shape=jax.ShapeDtypeStruct((B, plan.n_pad), out_dtype),
            grid=(grid_m,),
            in_specs=[
                pl.BlockSpec((tm, plan.k_pad), lambda i: (i, 0)),
                w_spec,
                pl.BlockSpec((1, plan.n_pad), lambda i: (0, 0)),
            ],
            out_specs=pl.BlockSpec((tm, plan.n_pad), lambda i: (i, 0)),
            compiler_params=pltpu.CompilerParams(
                dimension_semantics=("parallel",),
                vmem_limit_bytes=vmem_limit,
            ),
            cost_estimate=cost,
        )(x_flat, params.weight, params.bias)
        return out[:, :plan.n]

    # ---- K-tiled fallback (weight too large to hold VMEM-resident) ----
    # Only the (one-time) weight pad is hoisted; when n*n is not a multiple of
    # 128 the activation needs a K pad here — an extra activation round trip,
    # acceptable because this path only triggers for very large n where the
    # weight stream dominates.
    if plan.k_pad != plan.in_ch:
        x_flat = jnp.pad(x_flat, ((0, 0), (0, plan.k_pad - plan.in_ch)))
    grid_k = plan.k_pad // plan.tk

    needed = (2 * plan.n_pad * plan.tk * w_item
              + 2 * tm * plan.tk * x_item
              + 2 * tm * plan.n_pad * out_item
              + tm * plan.n_pad * 4
              + 2 * plan.n_pad * 4
              + 2 * _MiB)
    vmem_limit = int(min(plan.vmem_cap, max(needed, 32 * _MiB)))

    cost = pl.CostEstimate(
        flops=2 * B * plan.k_pad * plan.n_pad,
        transcendentals=0,
        bytes_accessed=(B * plan.k_pad * x_item
                        + grid_m * plan.n_pad * plan.k_pad * w_item  # W re-read per batch tile
                        + plan.n_pad * 4
                        + B * plan.n_pad * out_item),
    )

    out = pl.pallas_call(
        _ktiled_kernel,
        out_shape=jax.ShapeDtypeStruct((B, plan.n_pad), out_dtype),
        grid=(grid_m, grid_k),
        in_specs=[
            pl.BlockSpec((tm, plan.tk), lambda i, k: (i, k)),
            pl.BlockSpec((plan.n_pad, plan.tk), lambda i, k: (0, k)),
            pl.BlockSpec((1, plan.n_pad), lambda i, k: (0, 0)),
        ],
        out_specs=pl.BlockSpec((tm, plan.n_pad), lambda i, k: (i, 0)),
        scratch_shapes=[pltpu.VMEM((tm, plan.n_pad), jnp.float32)],
        compiler_params=pltpu.CompilerParams(
            dimension_semantics=("parallel", "arbitrary"),
            vmem_limit_bytes=vmem_limit,
        ),
        cost_estimate=cost,
    )(x_flat, params.weight, params.bias)
    return out[:, :plan.n]


if __name__ == "__main__":
    # Small, forward-consistent shapes: n_variables=8, batch=4.
    n_variables = 8
    batch = 4
    in_features = n_variables * n_variables

    key = jax.random.PRNGKey(0)
    kx, kw, kb = jax.random.split(key, 3)

    # Deterministic synthetic parameters (shapes from nn.Linear(n*n, n)).
    bound = 1.0 / jnp.sqrt(jnp.float32(in_features))
    weight = jax.random.uniform(
        kw, (n_variables, in_features), dtype=jnp.float32, minval=-bound, maxval=bound
    )
    bias = jax.random.uniform(
        kb, (n_variables,), dtype=jnp.float32, minval=-bound, maxval=bound
    )
    x = jax.random.normal(kx, (batch, n_variables, n_variables), dtype=jnp.float32)

    # One-time parameter prep (pad + cast) hoisted out of the forward path.
    # For production, compute_dtype=jnp.bfloat16 halves the weight HBM stream
    # (accumulation stays f32) at the cost of ~1e-2-level tolerance.
    params = prepare_c_encoder_params(weight, bias, compute_dtype=jnp.float32)

    out = c_encoder_forward(x, params)
    out = jax.block_until_ready(out)

    # Pure-JAX reference of the same math.
    ref = x.reshape(batch, -1) @ weight.T + bias
    assert out.shape == (batch, n_variables)
    assert jnp.allclose(out, ref, atol=1e-5, rtol=1e-5)

    print("KERNEL_OK")
</pallas_src>

<mosaic_0001>
module attributes {stable_mosaic.version = 11 : i64} {
  func.func @_resident_kernel(%arg0: i32, %arg1: memref<4x64xf32, #tpu.memory_space<vmem>>, %arg2: memref<128x64xf32, #tpu.memory_space<vmem>>, %arg3: memref<1x128xf32, #tpu.memory_space<vmem>>, %arg4: memref<4x128xf32, #tpu.memory_space<vmem>>) attributes {dimension_semantics = [#tpu.dimension_semantics<parallel>], iteration_bounds = array<i64: 1>, scalar_prefetch = 0 : i64, scratch_operands = 0 : i64, tpu.core_type = #tpu.core_type<tc>, window_params = [{transform_indices = @transform_0, window_bounds = array<i64: 4, 64>}, {pipeline_mode = #tpu.pipeline_mode<synchronous>, transform_indices = @transform_1, window_bounds = array<i64: 128, 64>}, {pipeline_mode = #tpu.pipeline_mode<synchronous>, transform_indices = @transform_2, window_bounds = array<i64: 1, 128>}, {transform_indices = @transform_3, window_bounds = array<i64: 4, 128>}]} {
    %c0 = arith.constant 0 : index
    %c0_0 = arith.constant 0 : index
    %0 = vector.load %arg1[%c0, %c0_0] : memref<4x64xf32, #tpu.memory_space<vmem>>, vector<4x64xf32>
    %c0_1 = arith.constant 0 : index
    %c0_2 = arith.constant 0 : index
    %1 = vector.load %arg2[%c0_1, %c0_2] : memref<128x64xf32, #tpu.memory_space<vmem>>, vector<128x64xf32>
    %cst = arith.constant dense<0.000000e+00> : vector<4x128xf32>
    %2 = tpu.matmul %0, %1, %cst {dimension_numbers = #tpu.dot_dimension_numbers<[1], [1], [0], [0], [0, 0, 1, 0], [], []>} : vector<4x64xf32>, vector<128x64xf32>, vector<4x128xf32> -> vector<4x128xf32>
    %c0_3 = arith.constant 0 : index
    %c0_4 = arith.constant 0 : index
    %3 = vector.load %arg3[%c0_3, %c0_4] : memref<1x128xf32, #tpu.memory_space<vmem>>, vector<1x128xf32>
    %4 = vector.broadcast %3 : vector<1x128xf32> to vector<4x128xf32>
    %5 = arith.addf %2, %4 : vector<4x128xf32>
    %c0_5 = arith.constant 0 : index
    %c0_6 = arith.constant 0 : index
    %6 = vector.load %arg4[%c0_5, %c0_6] : memref<4x128xf32, #tpu.memory_space<vmem>>, vector<4x128xf32>
    tpu.vector_store %arg4[%c0_5, %c0_6], %5 {strides = array<i32>} : memref<4x128xf32, #tpu.memory_space<vmem>>, vector<4x128xf32>,
    return
  }
  func.func @transform_0(%arg0: i32) -> (i32, i32) {
    %c0_i32 = arith.constant 0 : i32
    %c0_i32_0 = arith.constant 0 : i32
    return %arg0, %c0_i32 : i32, i32
  }
  func.func @transform_1(%arg0: i32) -> (i32, i32) {
    %c0_i32 = arith.constant 0 : i32
    %c0_i32_0 = arith.constant 0 : i32
    %c0_i32_1 = arith.constant 0 : i32
    return %c0_i32, %c0_i32_0 : i32, i32
  }
  func.func @transform_2(%arg0: i32) -> (i32, i32) {
    %c0_i32 = arith.constant 0 : i32
    %c0_i32_0 = arith.constant 0 : i32
    %c0_i32_1 = arith.constant 0 : i32
    return %c0_i32, %c0_i32_0 : i32, i32
  }
  func.func @transform_3(%arg0: i32) -> (i32, i32) {
    %c0_i32 = arith.constant 0 : i32
    %c0_i32_0 = arith.constant 0 : i32
    return %arg0, %c0_i32 : i32, i32
  }
}

</mosaic_0001>

<bundles_post_ra>
// kernel: tpu_custom_call.1
= control target key start
LH: loop header
LB: loop body
LE: loop exit
PB: predicated region body
PF: predicated region fallthrough
CT: control target
= control target key end

     0   :  { %vm39_vm0 = vcmask 523264   ;;  %v271_v1 = vmov 0.0   ;;  %vm272_vm1 = vmmov 0   ;;  %s368_s0 = inlined_call_operand.vmem [shape: f32[4,64], index: 0, kind: input, shape index: {}]   ;;  %s369_s1 = inlined_call_operand.vmem [shape: f32[128,64], index: 1, kind: input, shape index: {}]   ;;  %s370_s2 = inlined_call_operand.vmem [shape: f32[1,128], index: 2, kind: input, shape index: {}]   ;;  %s371_s3 = inlined_call_operand.hbm [shape: f32[4,128], index: 3, kind: output, shape index: {}]  }
   0x1   :  { %v31_v0 = vld [vmem:[%s369_s1 + $0x78] sm:$0xff]  ;;  %211 = vmatprep.subr.mxu0 %v271_v1  ;;  %243 = vmatprep.mubr.msk.f32.mxu0 %vm272_vm1, %v271_v1  ;;  %v30_v2 = vld [vmem:[%s369_s1 + $0x70] sm:$0xff] }
   0x2   :  { %212 = vmatpush3.xpose.msk.msra.mxu0 %vm39_vm0, %v31_v0 }
   0x3   :  { %213 = vmatprep.subr.mxu0 %v271_v1 }
   0x6   :  { %214 = vmatpush3.xpose.msk.msra.mxu0 %vm39_vm0, %v30_v2 }
   0x7   :  { %8 = vsyncpa [#allocation3], 0  ;;  %215 = vmatprep.subr.mxu0 %v271_v1  ;;  %v29_v3 = vld [vmem:[%s369_s1 + $0x68] sm:$0xff]  ;;  %v28_v4 = vld [vmem:[%s369_s1 + $0x60] sm:$0xff]  ;;  %s273_s21 = smov [#allocation2]  }
   0x8   :  { %v27_v5 = vld [vmem:[%s369_s1 + $0x58] sm:$0xff]  ;;  %v26_v6 = vld [vmem:[%s369_s1 + $0x50] sm:$0xff]  ;;  %v25_v7 = vld [vmem:[%s369_s1 + $0x48] sm:$0xff]  ;;  %s168_s22 = sshll.u32 %s273_s21, 4  ;;  %s169_s22 = int_to_ptr.vmem [resolvable:$true] %s168_s22 }
   0x9   :  { %v24_v8 = vld [vmem:[%s369_s1 + $0x40] sm:$0xff]  ;;  %v23_v9 = vld [vmem:[%s369_s1 + $0x38] sm:$0xff]  ;;  %v22_v10 = vld [vmem:[%s369_s1 + $0x30] sm:$0xff]  ;;  %p254_p1 = scmp.lt.s32.totalorder %s169_s22, %s169_s22 }
   0xa   :  { %216 = vmatpush3.xpose.msk.msra.mxu0 %vm39_vm0, %v29_v3  ;;  %v21_v11 = vld [vmem:[%s369_s1 + $0x28] sm:$0xff]  ;;  %v20_v12 = vld [vmem:[%s369_s1 + $0x20] sm:$0xff]  ;;  %v19_v13 = vld [vmem:[%s369_s1 + $0x18] sm:$0xff] }
   0xb   :  { %217 = vmatprep.subr.mxu0 %v271_v1  ;;  %v18_v14 = vld [vmem:[%s369_s1 + $0x10] sm:$0xff]  ;;  %v17_v15 = vld [vmem:[%s369_s1 + $0x8] sm:$0xff]  ;;  %v16_v16 = vld [vmem:[%s369_s1] sm:$0xff]  ;;  %s249_s1 = scalar_lea.vmem %s169_s22, 64 }
   0xc   :  { %v15_v17 = vld [vmem:[%s368_s0] sm:$0xf]  ;;  %p250_p0 = scmp.ne.s32.totalorder %s169_s22, %s249_s1  ;;  %p255_p2 = scmp.lt.s32.totalorder %s249_s1, %s249_s1 }
   0xd   :  { %v176_v18 = vld [vmem:[%s370_s2] ss:$0 sm:$0xff] }
   0xe   :  { %218 = vmatpush3.xpose.msk.msra.mxu0 %vm39_vm0, %v28_v4  ;;  %p256_p3 = por %p255_p2, %p254_p1 }
   0xf   :  { %219 = vmatprep.subr.mxu0 %v271_v1 }
  0x10   :  { %p257_p4 = pnand %p256_p3, %p250_p0 }
  0x12   :  { %220 = vmatpush3.xpose.msk.msra.mxu0 %vm39_vm0, %v27_v5 }
  0x13   :  { %221 = vmatprep.subr.mxu0 %v271_v1 }
  0x16   :  { %222 = vmatpush3.xpose.msk.msra.mxu0 %vm39_vm0, %v26_v6 }
  0x17   :  { %223 = vmatprep.subr.mxu0 %v271_v1 }
  0x1a   :  { %224 = vmatpush3.xpose.msk.msra.mxu0 %vm39_vm0, %v25_v7 }
  0x1b   :  { %225 = vmatprep.subr.mxu0 %v271_v1 }
  0x1e   :  { %226 = vmatpush3.xpose.msk.msra.mxu0 %vm39_vm0, %v24_v8 }
  0x1f   :  { %227 = vmatprep.subr.mxu0 %v271_v1 }
  0x22   :  { %228 = vmatpush3.xpose.msk.msra.mxu0 %vm39_vm0, %v23_v9 }
  0x23   :  { %229 = vmatprep.subr.mxu0 %v271_v1 }
  0x26   :  { %230 = vmatpush3.xpose.msk.msra.mxu0 %vm39_vm0, %v22_v10 }
  0x27   :  { %231 = vmatprep.subr.mxu0 %v271_v1 }
  0x2a   :  { %232 = vmatpush3.xpose.msk.msra.mxu0 %vm39_vm0, %v21_v11 }
  0x2b   :  { %233 = vmatprep.subr.mxu0 %v271_v1 }
  0x2e   :  { %234 = vmatpush3.xpose.msk.msra.mxu0 %vm39_vm0, %v20_v12 }
  0x2f   :  { %235 = vmatprep.subr.mxu0 %v271_v1 }
  0x32   :  { %236 = vmatpush3.xpose.msk.msra.mxu0 %vm39_vm0, %v19_v13 }
  0x33   :  { %237 = vmatprep.subr.mxu0 %v271_v1 }
  0x36   :  { %238 = vmatpush3.xpose.msk.msra.mxu0 %vm39_vm0, %v18_v14 }
  0x37   :  { %239 = vmatprep.subr.mxu0 %v271_v1 }
  0x3a   :  { %240 = vmatpush3.xpose.msk.msra.mxu0 %vm39_vm0, %v17_v15 }
  0x3b   :  { %241 = vmatprep.subr.mxu0 %v271_v1 }
  0x3e   :  { %242 = vmatpush3.xpose.msk.msra.mxu0 %vm39_vm0, %v16_v16 }
  0x41   :  { %244 = vmatmul.mubr.msk.f32.vlgmr.msra.gmra.mxu0 %vm39_vm0, %v15_v17 }
 0x101   :  { %v157_v19 = vpop.f32.mrf.mxu0 }
 0x102   :  { %v158_v20 = vadd.f32 %v176_v18, %v157_v19 }
 0x103   :  { %v245_v21 = vpop.f32.mrf.mxu0 }
 0x104   :  { %161 = vst [vmem:[#allocation2] sm:$0xf] %v158_v20 }
 0x105   :  { %260 = shalt.err (!%p257_p4)
}
 0x106   :  { %171 = dma.vmem_to_hbm [thread:$0]  %s169_s22, 64, %s371_s3, [#allocation3]  }
 0x107   :  { %269 = dma.done.wait [#allocation3], 64  }
 0x108   :  { %270 = vsyncadd [#allocation3], 4294967232 }
 0x109   :  { %175 = vsyncpa [#allocation3], 1 }

</bundles_post_ra>
